<compile_context>
chip_gen: v5e
topology: v5e:2x2
jax: 0.10.0
libtpu: 0.0.40
codegen_flags: <defaults>
</compile_context>

<pallas_src>
import jax
import jax.numpy as jnp
from jax.experimental import pallas as pl
from jax.experimental.pallas import tpu as pltpu


def _round_up(x, m):
    return (x + m - 1) // m * m


def _choose_spatial_tile(s, cin, n, itemsize=4,
                         tile_budget_bytes=2 * 1024 * 1024,
                         min_grid_steps=8, min_spatial_blocks=2):
    """Pick the spatial tile (multiple of 128 lanes).

    Constraints (in priority order):
      * per-tile input DMA <= tile_budget_bytes (keeps double-buffered VMEM small
        on v7x's 64 MiB/TC and under v5e's 16 MiB default scoped limit),
      * enough grid steps (n_batch * n_spatial_blocks >= min_grid_steps) for the
        BlockSpec pipeline to reach steady-state overlap,
      * >= min_spatial_blocks spatial blocks so v7x megacore can shard the
        "parallel" axes even when n == 1.
    """
    sp_chunks = max(1, _round_up(s, 128) // 128)          # S in 128-lane chunks
    cap_chunks = max(1, tile_budget_bytes // (cin * itemsize * 128))
    want_blocks = max(min_spatial_blocks, -(-min_grid_steps // max(1, n)))
    ts_chunks = min(cap_chunks, sp_chunks, max(1, sp_chunks // want_blocks))
    return ts_chunks * 128


# ----------------------------- Pallas kernel ---------------------------------

def _outconv1x1_kernel(x_ref, w_ref, b_ref, o_ref):
    # x_ref: (1, Cin, ts)   activation tile, spatial on the lane axis
    # w_ref: (Cout, Cin)    1x1x1 conv weight (resident, same block every step)
    # b_ref: (Cout, 1) f32  bias (broadcast over lanes)
    # o_ref: (1, Cout, ts)  output tile
    y = jnp.dot(w_ref[...], x_ref[0], preferred_element_type=jnp.float32)
    o_ref[0] = (y + b_ref[...]).astype(o_ref.dtype)       # fused bias, one store


# ----------------------------- wrapper ----------------------------------------

def outconv3d(x_ncdhw, weight, bias):
    """PyTorch OutConv3D.forward: Conv3d(Cin, Cout, kernel_size=1).

    x_ncdhw: [N, Cin, D, H, W]
    weight:  [Cout, Cin, 1, 1, 1] (or [Cout, Cin])
    bias:    [Cout]
    returns: [N, Cout, D, H, W] (same dtype as x)
    """
    N, Cin, D, H, W = x_ncdhw.shape
    Cout = weight.shape[0]
    if weight.ndim == 5:
        assert weight.shape[2:] == (1, 1, 1), "OutConv3D requires kernel_size=1"
    assert weight.reshape(Cout, -1).shape[1] == Cin

    in_dtype = x_ncdhw.dtype
    w = weight.reshape(Cout, Cin).astype(in_dtype)          # match activation dtype
    b_col = bias.reshape(Cout, 1).astype(jnp.float32)       # f32 bias / f32 accumulate

    S = D * H * W
    x = x_ncdhw.reshape(N, Cin, S)                           # free view, no copy

    itemsize = jnp.dtype(in_dtype).itemsize
    ts = _choose_spatial_tile(S, Cin, N, itemsize=itemsize)
    n_sp = pl.cdiv(S, ts)                                    # ragged last block is
                                                             # masked by Pallas

    cost = pl.CostEstimate(
        flops=2 * N * Cout * Cin * S,
        transcendentals=0,
        bytes_accessed=N * S * (Cin + Cout) * itemsize + Cout * (Cin + 1) * itemsize,
    )

    out = pl.pallas_call(
        _outconv1x1_kernel,
        out_shape=jax.ShapeDtypeStruct((N, Cout, S), in_dtype),
        grid_spec=pl.GridSpec(
            grid=(N, n_sp),
            in_specs=[
                pl.BlockSpec((1, Cin, ts), lambda n, j: (n, 0, j)),
                pl.BlockSpec((Cout, Cin), lambda n, j: (0, 0)),
                pl.BlockSpec((Cout, 1), lambda n, j: (0, 0)),
            ],
            out_specs=pl.BlockSpec((1, Cout, ts), lambda n, j: (n, 0, j)),
        ),
        compiler_params=pltpu.CompilerParams(
            dimension_semantics=("parallel", "parallel")),
        cost_estimate=cost,
    )(x, w, b_col)

    return out.reshape(N, Cout, D, H, W)


# ----------------------------- demo / self-check ------------------------------

if __name__ == "__main__":
    key = jax.random.PRNGKey(0)
    kx, kw, kb = jax.random.split(key, 3)

    N, Cin, Cout, D, H, W = 2, 32, 2, 16, 16, 16

    x = jax.random.normal(kx, (N, Cin, D, H, W), jnp.float32)
    # PyTorch Conv3d(k=1) default init: U(-1/sqrt(fan_in), 1/sqrt(fan_in))
    bound = 1.0 / (Cin ** 0.5)
    weight = jax.random.uniform(kw, (Cout, Cin, 1, 1, 1), jnp.float32, -bound, bound)
    bias = jax.random.uniform(kb, (Cout,), jnp.float32, -bound, bound)

    out = outconv3d(x, weight, bias)
    out = jax.block_until_ready(out)
    assert out.shape == (N, Cout, D, H, W), out.shape
    assert bool(jnp.all(jnp.isfinite(out)))

    # Pure-JAX reference (f32 operands, f32 accumulation in the kernel).
    ref = jnp.einsum('ncdhw,oc->nodhw', x, weight.reshape(Cout, Cin)) \
        + bias.reshape(1, Cout, 1, 1, 1)
    max_err = float(jnp.max(jnp.abs(out - ref)))
    assert max_err < 2e-2, max_err

    print("KERNEL_OK")
</pallas_src>

<mosaic_0001>
module attributes {stable_mosaic.version = 11 : i64} {
  func.func @_outconv1x1_kernel(%arg0: i32, %arg1: i32, %arg2: memref<1x32x1024xf32, #tpu.memory_space<vmem>>, %arg3: memref<2x32xf32, #tpu.memory_space<vmem>>, %arg4: memref<2x1xf32, #tpu.memory_space<vmem>>, %arg5: memref<1x2x1024xf32, #tpu.memory_space<vmem>>) attributes {dimension_semantics = [#tpu.dimension_semantics<parallel>, #tpu.dimension_semantics<parallel>], iteration_bounds = array<i64: 2, 4>, scalar_prefetch = 0 : i64, scratch_operands = 0 : i64, tpu.core_type = #tpu.core_type<tc>, window_params = [{transform_indices = @transform_0, window_bounds = array<i64: 1, 32, 1024>}, {pipeline_mode = #tpu.pipeline_mode<synchronous>, transform_indices = @transform_1, window_bounds = array<i64: 2, 32>}, {pipeline_mode = #tpu.pipeline_mode<synchronous>, transform_indices = @transform_2, window_bounds = array<i64: 2, 1>}, {transform_indices = @transform_3, window_bounds = array<i64: 1, 2, 1024>}]} {
    %c0 = arith.constant 0 : index
    %c0_0 = arith.constant 0 : index
    %0 = vector.load %arg3[%c0, %c0_0] : memref<2x32xf32, #tpu.memory_space<vmem>>, vector<2x32xf32>
    %c0_1 = arith.constant 0 : index
    %c0_2 = arith.constant 0 : index
    %c0_3 = arith.constant 0 : index
    %1 = vector.load %arg2[%c0_1, %c0_2, %c0_3] : memref<1x32x1024xf32, #tpu.memory_space<vmem>>, vector<1x32x1024xf32>
    %2 = vector.shape_cast %1 : vector<1x32x1024xf32> to vector<32x1024xf32>
    %cst = arith.constant dense<0.000000e+00> : vector<2x1024xf32>
    %3 = tpu.matmul %0, %2, %cst {dimension_numbers = #tpu.dot_dimension_numbers<[1], [0], [0], [1], [0, 0, 1, 1], [], []>} : vector<2x32xf32>, vector<32x1024xf32>, vector<2x1024xf32> -> vector<2x1024xf32>
    %c0_4 = arith.constant 0 : index
    %c0_5 = arith.constant 0 : index
    %4 = vector.load %arg4[%c0_4, %c0_5] : memref<2x1xf32, #tpu.memory_space<vmem>>, vector<2x1xf32>
    %5 = vector.broadcast %4 : vector<2x1xf32> to vector<2x1024xf32>
    %6 = arith.addf %3, %5 : vector<2x1024xf32>
    %c0_6 = arith.constant 0 : index
    %c0_7 = arith.constant 0 : index
    %c0_8 = arith.constant 0 : index
    %7 = vector.load %arg5[%c0_6, %c0_7, %c0_8] : memref<1x2x1024xf32, #tpu.memory_space<vmem>>, vector<1x2x1024xf32>
    %8 = vector.shape_cast %7 : vector<1x2x1024xf32> to vector<2x1024xf32>
    %9 = vector.shape_cast %6 : vector<2x1024xf32> to vector<1x2x1024xf32>
    tpu.vector_store %arg5[%c0_6, %c0_7, %c0_8], %9 {strides = array<i32>} : memref<1x2x1024xf32, #tpu.memory_space<vmem>>, vector<1x2x1024xf32>,
    return
  }
  func.func @transform_0(%arg0: i32, %arg1: i32) -> (i32, i32, i32) {
    %c0_i32 = arith.constant 0 : i32
    %c0_i32_0 = arith.constant 0 : i32
    return %arg0, %c0_i32, %arg1 : i32, i32, i32
  }
  func.func @transform_1(%arg0: i32, %arg1: i32) -> (i32, i32) {
    %c0_i32 = arith.constant 0 : i32
    %c0_i32_0 = arith.constant 0 : i32
    %c0_i32_1 = arith.constant 0 : i32
    return %c0_i32, %c0_i32_0 : i32, i32
  }
  func.func @transform_2(%arg0: i32, %arg1: i32) -> (i32, i32) {
    %c0_i32 = arith.constant 0 : i32
    %c0_i32_0 = arith.constant 0 : i32
    %c0_i32_1 = arith.constant 0 : i32
    return %c0_i32, %c0_i32_0 : i32, i32
  }
  func.func @transform_3(%arg0: i32, %arg1: i32) -> (i32, i32, i32) {
    %c0_i32 = arith.constant 0 : i32
    %c0_i32_0 = arith.constant 0 : i32
    return %arg0, %c0_i32, %arg1 : i32, i32, i32
  }
}

</mosaic_0001>

<bundles_post_ra>
// kernel: tpu_custom_call.1
= control target key start
LH: loop header
LB: loop body
LE: loop exit
PB: predicated region body
PF: predicated region fallthrough
CT: control target
= control target key end

     0   :  { %8 = vsyncpa [#allocation3], 0  ;;  %s1006_s0 = inlined_call_operand.hbm [shape: f32[2,32,4096], index: 0, kind: input, shape index: {}]   ;;  %s1007_s1 = inlined_call_operand.vmem [shape: f32[2,32], index: 1, kind: input, shape index: {}]   ;;  %s1008_s2 = inlined_call_operand.vmem [shape: f32[2,1], index: 2, kind: input, shape index: {}]   ;;  %s1009_s3 = inlined_call_operand.hbm [shape: f32[2,2,4096], index: 3, kind: output, shape index: {}]  }
   0x1   :  { %10 = vsyncpa [#allocation3 + $0x1], 0 }
   0x2   :  { %11 = vsyncpa [#allocation4], 0 }
   0x3   :  { %13 = vsyncpa [#allocation4 + $0x1], 0  ;;  %s809_s12 = smov 0   ;;  %s811_s13 = smov 0  }
   0x4   :  { %s813_s14 = smov 0   ;;  %s815_s15 = smov 0  }
   0x5   :  { %s817_s16 = smov 0   ;;  %s819_s17 = smov 0  }
   0x6   :  { %s821_s18 = smov 0   ;;  %s823_s19 = smov 0  }
   0x7 LB: > { %1013 = sst [smem:[#allocation8_spill]] %s775_s17  ;;  %s547_s20 = sadd.s32 4294967295, %s783_s19   ;;  %s783_s19 = sphi %s823_s19, %s19_s19   ;;  %s779_s18 = sphi %s821_s18, %s1029_s18   ;;  %s775_s17 = sphi %s819_s17, %s1023_s17   ;;  %s771_s16 = sphi %s817_s16, %s1028_s16   ;;  %s767_s15 = sphi %s815_s15, %s1022_s15   ;;  %s763_s14 = sphi %s813_s14, %s1027_s14   ;;  %s759_s13 = sphi %s811_s13, %s1026_s13   ;;  %s755_s12 = sphi %s809_s12, %s1025_s12  }
   0x8   : > { %s548_s21 = sadd.s32 4294967294, %s783_s19   ;;  %s28_s22 = sadd.s32 1, %s775_s17 }
   0x9   : > { %s31_s23 = sadd.s32 1, %s779_s18  ;;  %p29_p0 = scmp.ge.s32.totalorder %s28_s22, 4 }
   0xa   : > { %s40_s24 = sadd.s32 1, %s763_s14  ;;  %p47_p1 = scmp.ne.s32.totalorder %s763_s14, %s759_s13 }
   0xb   : > { %p48_p2 = scmp.eq.s32.totalorder %s783_s19, 0  ;;  %s1031_s22 = smov (%p29_p0, %s28_s22), 0 }
   0xc   : > { %1014 = sst [smem:[#allocation9_spill]] %s1031_s22  ;;  %s1033_s23 = smov (!%p29_p0, %s31_s23), %s779_s18 }
   0xd   : > { %s36_s25 = ssub.s32 %s775_s17, %s1031_s22  ;;  %p862_p3 = por %p48_p2, %p47_p1 }
   0xe   : > { %p33_p4 = scmp.ge.s32.totalorder %s1033_s23, 2  ;;  %p53_p5 = scmp.ne.s32.totalorder %s759_s13, %s755_s12 }
   0xf   : > { %p54_p6 = scmp.eq.s32.totalorder %s547_s20, 0  ;;  %p121_p7 = scmp.eq.s32.totalorder %s547_s20, 7 }
  0x10   : > { %s1035_s23 = smov (%p33_p4, %s1033_s23), 0  ;;  %p127_p10 = scmp.eq.s32.totalorder %s548_s21, 7 }
  0x11   : > { %1016 = sst [smem:[#allocation10_spill]] %s1035_s23  ;;  %p870_p8 = por %p54_p6, %p53_p5 }
  0x12   : > { %p874_p9 = por %p121_p7, %p47_p1  ;;  %s35_s29 = ssub.s32 %s779_s18, %s1035_s23 }
  0x13   : > { %s37_s30 = sor.u32 %s36_s25, %s35_s29  ;;  %p880_p12 = por %p127_p10, %p53_p5 }
  0x14   : > { %p38_p11 = scmp.eq.s32.totalorder %s37_s30, 0  ;;  %p584_p13 = scmp.lt.s32.totalorder %s783_s19, 8 }
  0x15   : > { %s153_s5 = sand.u32 1, %s763_s14   ;;  %s552_s8 = sshll.u32 %s775_s17, 3 }
  0x16   : > { %s887_s6 = scalar_select %p38_p11, %s763_s14, %s40_s24  }
  0x17   : > { %s551_s7 = sshll.u32 %s153_s5, 8  ;;  %s553_s9 = sshll.u32 %s779_s18, 7 }
  0x18   : > { %1020 = sst [smem:[#allocation11_spill]] %s887_s6  ;;  %s157_s10 = scalar_lea.vmem [#allocation2], %s551_s7 }
  0x19   : > { %s167_s11 = sshll.u32 %s157_s10, 4  ;;  %s162_s20 = sadd.s32 %s553_s9, %s552_s8  ;;  %s168_s11 = int_to_ptr.vmem [resolvable:$true] %s167_s11 }
  0x1a   : > { %s554_s21 = sshll.u32 %s162_s20, 3  ;;  %p577_p0 = pnand %p584_p13, %p862_p3 }
  0x1b   : > { %s164_s30 = scalar_lea.hbm %s1006_s0, %s554_s21  ;;  %p555_p1 = scmp.ge.s32.totalorder %s783_s19, 1 }
  0x1c   : > { %s165_s23 = sshll.u32 %s164_s30, 4  ;;  %s154_s24 = scalar_lea.sflag [#allocation3], %s153_s5  ;;  %s166_s23 = int_to_ptr.hbm [resolvable:$true] %s165_s23 }
  0x1d   : > { %s785_s22 = smov 4096   ;;  %s786_s6 = smov 1024  }
  0x1e   : > { %s787_s17 = smov 64   ;;  %p175_p2 = scmp.lt.s32.totalorder %s783_s19, 9 }
  0x1f   : > { %579 = dma.hbm_to_vmem [thread:$0]  (!%p577_p0), %s166_s23, 4096, %s168_s11, %s154_s24, %s785_s22, %s786_s6, %s787_s17  }
  0x20   : > { %p176_p4 = pnand %p555_p1, %p175_p2 }
  0x21   : > { %s899_s7 = sand.u32 (!%p176_p4), 1, %s759_s13  }
  0x22   : > { %179 = sbr.rel (%p176_p4) target bundleno = 199 (0xc7), region = 32  ;;  %s556_s26 = sshll.u32 (!%p176_p4), %s899_s7, 8 }
  0x23   : > { %s182_s8 = scalar_lea.sflag (!%p176_p4), [#allocation3], %s899_s7  ;;  %s903_s9 = scalar_lea.vmem (!%p176_p4), [#allocation2], %s556_s26 }
  0x27   : > { %746 = dma.done.wait (%p870_p8), %s182_s8, 4096  }
  0x28   : > { %748 = vsyncadd (%p870_p8), %s182_s8, 4294963200  ;;  %v788_v0 = vmov 0   ;;  %v238_v1 = vld [vmem:[%s903_s9 + $0xd0] sm:$0xff]  ;;  %v239_v2 = vld [vmem:[%s903_s9 + $0xd8] sm:$0xff]  ;;  %vm250_vm0 = vcmask 261120   ;;  %s567_s5 = sshll.u32 %s767_s15, 3 }
  0x29   : > { %654 = vset.pattern.permute.xlu0 %v788_v0  ;;  %v230_v3 = vld [vmem:[%s903_s9 + $0x90] sm:$0xff]  ;;  %306 = vmatpush.msra.mxu2 %v238_v1  ;;  %v231_v4 = vld [vmem:[%s903_s9 + $0x98] sm:$0xff]  ;;  %v237_v5 = vld [vmem:[%s903_s9 + $0xc8] sm:$0xff]  ;;  %s568_s6 = sshll.u32 %s771_s16, 5  ;;  %vm428_vm1 = vcmask 1041408   ;;  %s557_s10 = sshll.u32 %s899_s7, 4 }
  0x2a   : > { %326 = vmatpush.msra.mxu3 %v239_v2  ;;  %v222_v6 = vld [vmem:[%s903_s9 + $0x50] sm:$0xff]  ;;  %286 = vmatpush.msra.mxu1 %v237_v5  ;;  %v223_v7 = vld [vmem:[%s903_s9 + $0x58] sm:$0xff]  ;;  %v236_v8 = vld [vmem:[%s903_s9 + $0xc0] sm:$0xff]  ;;  %vm430_vm2 = vcmask 1045508   ;;  %s453_s11 = sadd.s32 %s568_s6, %s567_s5  ;;  %vm432_vm3 = vcmask 1043456   ;;  %s208_s15 = scalar_lea.vmem [#allocation5], %s557_s10 }
  0x2b   : > { %v229_v9 = vld [vmem:[%s903_s9 + $0x88] sm:$0xff]  ;;  %307 = vmatpush.msra.mxu2 %v230_v3  ;;  %266 = vmatpush.msra.mxu0 %v236_v8  ;;  %v214_v10 = vld [vmem:[%s903_s9 + $0x10] sm:$0xff]  ;;  %v215_v11 = vld [vmem:[%s903_s9 + $0x18] sm:$0xff]  ;;  %s569_s20 = sshll.u32 %s453_s11, 1  ;;  %s457_s29 = sshll.u32 %s208_s15, 4  ;;  %s458_s29 = int_to_ptr.vmem [resolvable:$true] %s457_s29 }
  0x2c   : > { %327 = vmatpush.msra.mxu3 %v231_v4  ;;  %287 = vmatpush.msra.mxu1 %v229_v9  ;;  %v228_v12 = vld [vmem:[%s903_s9 + $0x80] sm:$0xff]  ;;  %v221_v14 = vld [vmem:[%s903_s9 + $0x48] sm:$0xff]  ;;  %v242_v15 = vld [vmem:[%s903_s9 + $0xf0] sm:$0xff]  ;;  %s455_s25 = scalar_lea.hbm %s1009_s3, %s569_s20  ;;  %s442_s24 = scalar_lea.sflag [#allocation4], %s899_s7 }
  0x2d   : > { %308 = vmatpush.msra.mxu2 %v222_v6  ;;  %v211_v13 = vld [vmem:[%s1007_s1] sm:$0x3]  ;;  %v243_v16 = vld [vmem:[%s903_s9 + $0xf8] sm:$0xff]  ;;  %267 = vmatpush.msra.mxu0 %v228_v12  ;;  %v213_v18 = vld [vmem:[%s903_s9 + $0x8] sm:$0xff]  ;;  %s459_s30 = sshll.u32 %s455_s25, 4  ;;  %s705_s22 = scalar_lea.hbm %s1009_s3, 128  ;;  %s460_s30 = int_to_ptr.hbm [resolvable:$true] %s459_s30 }
  0x2e   : > { %328 = vmatpush.msra.mxu3 %v223_v7  ;;  %288 = vmatpush.msra.mxu1 %v221_v14  ;;  %v220_v17 = vld [vmem:[%s903_s9 + $0x40] sm:$0xff]  ;;  %v234_v19 = vld [vmem:[%s903_s9 + $0xb0] sm:$0xff]  ;;  %v235_v20 = vld [vmem:[%s903_s9 + $0xb8] sm:$0xff]  ;;  %s699_s26 = sshra.s32 %s460_s30, 4  ;;  %s700_s26 = int_to_ptr.hbm [resolvable:$true] %s699_s26 }
  0x2f   : > { %309 = vmatpush.msra.mxu2 %v214_v10  ;;  %v212_v21 = vld [vmem:[%s903_s9] sm:$0xff]  ;;  %268 = vmatpush.msra.mxu0 %v220_v17  ;;  %v226_v22 = vld [vmem:[%s903_s9 + $0x70] sm:$0xff]  ;;  %v227_v23 = vld [vmem:[%s903_s9 + $0x78] sm:$0xff]  ;;  %s701_s8 = scalar_lea.hbm %s700_s26, 16  ;;  %p706_p7 = scmp.lt.s32.totalorder %s700_s26, %s1009_s3 }
  0x30   : > { %329 = vmatpush.msra.mxu3 %v215_v11  ;;  %560 = vmatmul.msk.f32.vlgmr.msra.gmra.mxu2 %vm250_vm0, %v211_v13  ;;  %v241_v24 = vld [vmem:[%s903_s9 + $0xe8] sm:$0xff]  ;;  %v218_v25 = vld [vmem:[%s903_s9 + $0x30] sm:$0xff]  ;;  %v219_v26 = vld [vmem:[%s903_s9 + $0x38] sm:$0xff]  ;;  %p702_p3 = scmp.ne.s32.totalorder %s700_s26, %s701_s8  ;;  %p707_p8 = scmp.lt.s32.totalorder %s705_s22, %s701_s8 }
  0x31   : > { %561 = vmatmul.msk.f32.vlgmr.msra.gmra.mxu3 %vm250_vm0, %v211_v13  ;;  %386 = vmatpush.msrb.mxu2 %v242_v15  ;;  %v240_v27 = vld [vmem:[%s903_s9 + $0xe0] sm:$0xff]  ;;  %v233_v28 = vld [vmem:[%s903_s9 + $0xa8] sm:$0xff] }
  0x32   : > { %406 = vmatpush.msrb.mxu3 %v243_v16  ;;  %289 = vmatpush.msra.mxu1 %v213_v18  ;;  %v232_v29 = vld [vmem:[%s903_s9 + $0xa0] sm:$0xff]  ;;  %v225_v30 = vld [vmem:[%s903_s9 + $0x68] sm:$0xff]  ;;  %p703_p5 = pnand %p702_p3, %p874_p9  ;;  %p708_p10 = por %p707_p8, %p706_p7 }
  0x33   : > { %387 = vmatpush.msrb.mxu2 %v234_v19  ;;  %559 = vmatmul.msk.f32.vlgmr.msra.gmra.mxu1 %vm250_vm0, %v211_v13  ;;  %v244_v31 = vld [vmem:[%s1008_s2] sm:$0x3]  ;;  %v217_v33 = vld [vmem:[%s903_s9 + $0x28] sm:$0xff] }
  0x34   : > { %407 = vmatpush.msrb.mxu3 %v235_v20  ;;  %269 = vmatpush.msra.mxu0 %v212_v21  ;;  %v224_v32 = vld [vmem:[%s903_s9 + $0x60] sm:$0xff]  ;;  %p704_p6 = pneg %p703_p5 }
  0x35   : > { %388 = vmatpush.msrb.mxu2 %v226_v22  ;;  %366 = vmatpush.msrb.mxu1 %v241_v24  ;;  %v216_v34 = vld [vmem:[%s903_s9 + $0x20] sm:$0xff] }
  0x36   : > { %408 = vmatpush.msrb.mxu3 %v227_v23  ;;  %558 = vmatmul.msk.f32.vlgmr.msra.gmra.mxu0 %vm250_vm0, %v211_v13  ;;  %p709_p11 = pnand %p708_p10, %p704_p6 }
  0x37   : > { %389 = vmatpush.msrb.mxu2 %v218_v25  ;;  %346 = vmatpush.msrb.mxu0 %v240_v27 }
  0x38   : > { %409 = vmatpush.msrb.mxu3 %v219_v26  ;;  %367 = vmatpush.msrb.mxu1 %v233_v28 }
  0x39   : > { %564 = vmatmul.msk.f32.vlgmr.msrb.gmra.mxu2 %vm250_vm0, %v211_v13  ;;  %565 = vmatmul.msk.f32.vlgmr.msrb.gmra.mxu3 %vm250_vm0, %v211_v13 }
  0x3a   : > { %347 = vmatpush.msrb.mxu0 %v232_v29  ;;  %368 = vmatpush.msrb.mxu1 %v225_v30 }
  0x3b   : > { %247 = vperm.xlu0 %654, %v244_v31  }
  0x3c   : > { %348 = vmatpush.msrb.mxu0 %v224_v32  ;;  %369 = vmatpush.msrb.mxu1 %v217_v33 }
  0x3d   : > { %563 = vmatmul.msk.f32.vlgmr.msrb.gmra.mxu1 %vm250_vm0, %v211_v13 }
  0x3e   : > { %349 = vmatpush.msrb.mxu0 %v216_v34 }
  0x3f   : > { %562 = vmatmul.msk.f32.vlgmr.msrb.gmra.mxu0 %vm250_vm0, %v211_v13 }
  0xad   : > { %v248_v35 = vpop.permute.xlu0 %247 }
  0xb0   : > { %v291_v36 = vpop.f32.mrf.mxu1 }
  0xb1   : > { %v292_v37 = vadd.f32 %v291_v36, %v248_v35 }
  0xb3   : > { %v271_v38 = vpop.f32.mrf.mxu0  ;;  %v311_v39 = vpop.f32.mrf.mxu2  ;;  %v422_v41 = vrot.slane %v292_v37, 6 }
  0xb4   : > { %v272_v40 = vadd.f32 %v271_v38, %v248_v35  ;;  %v312_v42 = vadd.f32 %v311_v39, %v248_v35  ;;  %v331_v43 = vpop.f32.mrf.mxu3 }
  0xb5   : > { %v332_v44 = vadd.f32 %v331_v43, %v248_v35 }
  0xb6   : > { %v423_v45 = vrot.slane %v312_v42, 4  ;;  %v429_v46 = vsel %vm428_vm1, %v272_v40, %v422_v41 }
  0xb7   : > { %v424_v47 = vrot.slane %v332_v44, 2 }
  0xb9   : > { %v431_v48 = vsel %vm430_vm2, %v423_v45, %v424_v47 }
  0xba   : > { %v433_v49 = vsel %vm432_vm3, %v429_v46, %v431_v48  ;;  %v371_v50 = vpop.f32.mrf.mxu1 }
  0xbb   : > { %v372_v51 = vadd.f32 %v371_v50, %v248_v35  ;;  %439 = vst [vmem:[%s208_s15] sm:$0xff] %v433_v49 }
  0xbc   : > { %v351_v52 = vpop.f32.mrf.mxu0  ;;  %v391_v53 = vpop.f32.mrf.mxu2 }
  0xbd   : > { %v392_v54 = vadd.f32 %v391_v53, %v248_v35  ;;  %v411_v55 = vpop.f32.mrf.mxu3  ;;  %v425_v56 = vrot.slane %v372_v51, 6  ;;  %v352_v57 = vadd.f32 %v351_v52, %v248_v35 }
  0xbe   : > { %v412_v58 = vadd.f32 %v411_v55, %v248_v35 }
  0xbf   : > { %v426_v59 = vrot.slane %v392_v54, 4  ;;  %v434_v61 = vsel %vm428_vm1, %v352_v57, %v425_v56 }
  0xc0   : > { %v427_v60 = vrot.slane %v412_v58, 2 }
  0xc2   : > { %v435_v62 = vsel %vm430_vm2, %v426_v59, %v427_v60 }
  0xc3   : > { %v436_v63 = vsel %vm432_vm3, %v434_v61, %v435_v62 }
  0xc4   : > { %440 = vst [vmem:[%s208_s15 + $0x8] sm:$0xff] %v436_v63 }
  0xc5   : > { %712 = shalt.err (!%p709_p11)
}
  0xc6   : > { %574 = dma.vmem_to_hbm [thread:$0]  (%p874_p9), %s458_s29, 256, %s460_s30, %s442_s24  }
  0xc7 PF: > { %p585_p13 = scmp.ge.s32.totalorder %s783_s19, 2  ;;  %s471_s7 = sand.u32 1, %s755_s12  }
  0xc8   : > { %s472_s5 = scalar_lea.sflag [#allocation4], %s471_s7 }
  0xc9   : > { %p581_p0 = pnand %p585_p13, %p880_p12 }
  0xcb   : > { %p582_p1 = pneg %p581_p0 }
  0xcd   : > { %750 = dma.done.wait (%p582_p1), %s472_s5, 256  }
  0xce   : > { %752 = vsyncadd (%p582_p1), %s472_s5, 4294967040  ;;  %s19_s19 = sadd.s32 1, %s783_s19   ;;  %s1021_s6 = sld [smem:[#allocation11_spill]] }
  0xcf   : > { %p16_p2 = scmp.ge.s32.totalorder %s19_s19, 10   ;;  %s1022_s15 = sld [smem:[#allocation8_spill]] }
  0xd0   : > { %s1023_s17 = sld [smem:[#allocation9_spill]]  ;;  %s1025_s12 = smov %s759_s13 }
  0xd1   : > { %s1024_s28 = sld [smem:[#allocation10_spill]]  ;;  %s1026_s13 = smov %s763_s14 }
  0xd2   : > { %s1028_s16 = smov %s779_s18 }
  0xd3   :  { %18 = sbr.rel (!%p16_p2) target bundleno = 7 (0x7), region = 77 }
  0xd4   : > { %s1027_s14 = smov %s1021_s6 }
  0xd7   : > { %s1029_s18 = smov %s1024_s28 }
  0xd8   :  { %478 = vsyncpa [#allocation3], 1 }
  0xd9   :  { %480 = vsyncpa [#allocation3 + $0x1], 1 }
  0xda   :  { %481 = vsyncpa [#allocation4], 1 }
  0xdb   :  { %483 = vsyncpa [#allocation4 + $0x1], 1 }

</bundles_post_ra>
